<compile_context>
chip_gen: v7x
topology: tpu7x:2x2x1
jax: 0.10.0
libtpu: 0.0.40
codegen_flags: <defaults>
</compile_context>

<pallas_src>
import functools

import numpy as np
import jax
import jax.numpy as jnp
from jax import lax
from jax.experimental import pallas as pl
from jax.experimental.pallas import tpu as pltpu


def _focal_loss_kernel(gamma, logits_ref, tgt_ref, alpha_ref, weight_ref,
                       num_ref, den_ref):
    """One batch tile: accumulate focal-NLL numerator and weight denominator."""
    step = pl.program_id(0)

    @pl.when(step == 0)
    def _():
        num_ref[...] = jnp.zeros_like(num_ref)
        den_ref[...] = jnp.zeros_like(den_ref)

    x = logits_ref[...].astype(jnp.float32)                    # [TN, C_pad]

    # log_softmax (padded classes carry -1e30 and contribute exp(.) == 0)
    m = jnp.max(x, axis=1, keepdims=True)                      # [TN, 1]
    z = x - m
    lse = jnp.log(jnp.sum(jnp.exp(z), axis=1, keepdims=True))  # [TN, 1]
    logpt = z - lse                                            # [TN, C_pad]
    pt = jnp.exp(logpt)
    focal = ((1.0 - pt) ** gamma) * logpt                      # [TN, C_pad]

    # one-hot of the target class; padded rows carry target = -1 -> all False
    tgt = tgt_ref[...]                                         # [TN, 1] int32
    cls = lax.broadcasted_iota(jnp.int32, focal.shape, 1)      # [TN, C_pad]
    onehot = cls == tgt                                        # [TN, C_pad]

    aw = alpha_ref[...] * weight_ref[...]                      # [1, C_pad]

    # numerator: -sum_n w[t] * alpha[t] * focal[n, t]
    num_part = -jnp.sum(jnp.where(onehot, focal * aw, 0.0))
    # denominator: sum_n w[t]  (== number of real rows when weight is None)
    den_part = jnp.sum(jnp.where(onehot, weight_ref[...], 0.0))

    num_ref[...] += jnp.reshape(num_part, (1, 1))
    den_ref[...] += jnp.reshape(den_part, (1, 1))


def focal_loss_pallas(logits, target, *, alpha=1.0, gamma=2, weight=None,
                      label_num=None, block_n=128):
    """Focal loss, matching FocalLoss.forward(input, target)."""
    N, C = logits.shape
    if label_num is None:
        label_num = C
    assert label_num == C, "label_num must match the number of classes C"

    # static per-class alpha vector (host side) — equivalent to the masked
    # scatter loop in the PyTorch forward for integer targets in [0, n).
    percents = 1.0 + (label_num - 1) * alpha
    alpha_vec = np.full((C,), alpha / percents, dtype=np.float32)
    alpha_vec[0] = 1.0 / percents
    if weight is None:
        weight_vec = np.ones((C,), dtype=np.float32)
    else:
        weight_vec = np.asarray(weight, dtype=np.float32)

    # tile sizing: sublane-aligned batch tile, lane-dense (128-mult) class dim
    block_n = max(8, (block_n // 8) * 8)
    N_pad = ((N + block_n - 1) // block_n) * block_n
    C_pad = ((C + 127) // 128) * 128

    # pad: classes/rows with -1e30 logits (exp -> 0, never selected),
    # padded rows get target = -1 so their one-hot is all-false (0 contribution)
    logits_pad = jnp.pad(logits.astype(jnp.float32),
                         ((0, N_pad - N), (0, C_pad - C)),
                         constant_values=-1e30)
    target_pad = jnp.pad(target.astype(jnp.int32).reshape(N, 1),
                         ((0, N_pad - N), (0, 0)),
                         constant_values=-1)
    alpha_pad = np.zeros((1, C_pad), dtype=np.float32)
    alpha_pad[0, :C] = alpha_vec
    weight_pad = np.zeros((1, C_pad), dtype=np.float32)
    weight_pad[0, :C] = weight_vec

    grid = (N_pad // block_n,)
    num, den = pl.pallas_call(
        functools.partial(_focal_loss_kernel, gamma),
        out_shape=(
            jax.ShapeDtypeStruct((1, 1), jnp.float32),
            jax.ShapeDtypeStruct((1, 1), jnp.float32),
        ),
        grid=grid,
        in_specs=[
            pl.BlockSpec((block_n, C_pad), lambda i: (i, 0)),   # logits tile
            pl.BlockSpec((block_n, 1), lambda i: (i, 0)),       # target tile
            pl.BlockSpec((1, C_pad), lambda i: (0, 0)),         # alpha (reused)
            pl.BlockSpec((1, C_pad), lambda i: (0, 0)),         # weight (reused)
        ],
        out_specs=(
            pl.BlockSpec((1, 1), lambda i: (0, 0)),
            pl.BlockSpec((1, 1), lambda i: (0, 0)),
        ),
        compiler_params=pltpu.CompilerParams(
            dimension_semantics=("arbitrary",)),
    )(logits_pad, target_pad, jnp.asarray(alpha_pad), jnp.asarray(weight_pad))

    return (num[0, 0] / den[0, 0]).astype(jnp.float32)


if __name__ == "__main__":
    key = jax.random.PRNGKey(0)
    N, C = 16, 6
    alpha, gamma, label_num = 2.0, 2, C

    k1, k2 = jax.random.split(key)
    logits = jax.random.normal(k1, (N, C), dtype=jnp.float32) * 2.0
    target = jax.random.randint(k2, (N,), 0, C).astype(jnp.int32)

    loss = focal_loss_pallas(logits, target, alpha=alpha, gamma=gamma,
                             label_num=label_num, block_n=8)
    loss = jax.block_until_ready(loss)

    # --- plain numpy reference mimicking the PyTorch forward (weight=None) ---
    x = np.asarray(logits, dtype=np.float64)
    t = np.asarray(target)
    m = x.max(axis=1, keepdims=True)
    z = x - m
    logpt = z - np.log(np.exp(z).sum(axis=1, keepdims=True))
    pt = np.exp(logpt)
    focal = (1.0 - pt) ** gamma * logpt
    percents = 1.0 + (label_num - 1) * alpha
    alist = np.array([1.0 / percents] + [alpha / percents] * (label_num - 1))
    a_t = alist[t]
    picked = focal[np.arange(N), t]
    ref_loss = -(a_t * picked).mean()

    assert abs(float(loss) - ref_loss) < 1e-4, (float(loss), ref_loss)
    print("KERNEL_OK")
</pallas_src>

<mosaic_0001>
module attributes {stable_mosaic.version = 11 : i64} {
  func.func @_focal_loss_kernel(%arg0: i32, %arg1: memref<8x128xf32, #tpu.memory_space<vmem>>, %arg2: memref<8x1xi32, #tpu.memory_space<vmem>>, %arg3: memref<1x128xf32, #tpu.memory_space<vmem>>, %arg4: memref<1x128xf32, #tpu.memory_space<vmem>>, %arg5: memref<1x1xf32, #tpu.memory_space<vmem>>, %arg6: memref<1x1xf32, #tpu.memory_space<vmem>>) attributes {dimension_semantics = [#tpu.dimension_semantics<arbitrary>], iteration_bounds = array<i64: 2>, scalar_prefetch = 0 : i64, scratch_operands = 0 : i64, tpu.core_type = #tpu.core_type<tc>, window_params = [{transform_indices = @transform_0, window_bounds = array<i64: 8, 128>}, {transform_indices = @transform_1, window_bounds = array<i64: 8, 1>}, {pipeline_mode = #tpu.pipeline_mode<synchronous>, transform_indices = @transform_2, window_bounds = array<i64: 1, 128>}, {pipeline_mode = #tpu.pipeline_mode<synchronous>, transform_indices = @transform_3, window_bounds = array<i64: 1, 128>}, {pipeline_mode = #tpu.pipeline_mode<synchronous>, transform_indices = @transform_4, window_bounds = array<i64: 1, 1>}, {pipeline_mode = #tpu.pipeline_mode<synchronous>, transform_indices = @transform_5, window_bounds = array<i64: 1, 1>}]} {
    %c0_i32 = arith.constant 0 : i32
    %0 = arith.cmpi eq, %arg0, %c0_i32 : i32
    %1 = arith.extui %0 : i1 to i32
    %c0_i32_0 = arith.constant 0 : i32
    %2 = arith.cmpi ne, %1, %c0_i32_0 : i32
    scf.if %2 {
      %cst_25 = arith.constant 0.000000e+00 : f32
      %52 = vector.broadcast %cst_25 : f32 to vector<1x1xf32>
      %c0_26 = arith.constant 0 : index
      %c0_27 = arith.constant 0 : index
      %53 = vector.load %arg5[%c0_26, %c0_27] : memref<1x1xf32, #tpu.memory_space<vmem>>, vector<1x1xf32>
      tpu.vector_store %arg5[%c0_26, %c0_27], %52 {strides = array<i32>} : memref<1x1xf32, #tpu.memory_space<vmem>>, vector<1x1xf32>,
      %cst_28 = arith.constant 0.000000e+00 : f32
      %54 = vector.broadcast %cst_28 : f32 to vector<1x1xf32>
      %c0_29 = arith.constant 0 : index
      %c0_30 = arith.constant 0 : index
      %55 = vector.load %arg6[%c0_29, %c0_30] : memref<1x1xf32, #tpu.memory_space<vmem>>, vector<1x1xf32>
      tpu.vector_store %arg6[%c0_29, %c0_30], %54 {strides = array<i32>} : memref<1x1xf32, #tpu.memory_space<vmem>>, vector<1x1xf32>,
    } else {
    }
    %c0 = arith.constant 0 : index
    %c0_1 = arith.constant 0 : index
    %3 = vector.load %arg1[%c0, %c0_1] : memref<8x128xf32, #tpu.memory_space<vmem>>, vector<8x128xf32>
    %cst = arith.constant dense<0xFF800000> : vector<8xf32>
    %4 = vector.multi_reduction <maximumf>, %3, %cst [1] : vector<8x128xf32> to vector<8xf32>
    %5 = vector.shape_cast %4 : vector<8xf32> to vector<8x1xf32>
    %6 = vector.broadcast %5 : vector<8x1xf32> to vector<8x128xf32>
    %7 = arith.subf %3, %6 : vector<8x128xf32>
    %8 = math.exp %7 : vector<8x128xf32>
    %cst_2 = arith.constant dense<0.000000e+00> : vector<8xf32>
    %9 = vector.multi_reduction <add>, %8, %cst_2 [1] : vector<8x128xf32> to vector<8xf32>
    %10 = vector.shape_cast %9 : vector<8xf32> to vector<8x1xf32>
    %11 = math.log %10 : vector<8x1xf32>
    %12 = vector.broadcast %11 : vector<8x1xf32> to vector<8x128xf32>
    %13 = arith.subf %7, %12 : vector<8x128xf32>
    %14 = math.exp %13 : vector<8x128xf32>
    %cst_3 = arith.constant 1.000000e+00 : f32
    %15 = vector.broadcast %cst_3 : f32 to vector<8x128xf32>
    %16 = arith.subf %15, %14 : vector<8x128xf32>
    %17 = arith.mulf %16, %16 : vector<8x128xf32>
    %18 = arith.mulf %17, %13 : vector<8x128xf32>
    %c0_4 = arith.constant 0 : index
    %c0_5 = arith.constant 0 : index
    %19 = vector.load %arg2[%c0_4, %c0_5] : memref<8x1xi32, #tpu.memory_space<vmem>>, vector<8x1xi32>
    %20 = tpu.iota {dimensions = array<i32: 1>} : vector<8x128xi32>
    %21 = vector.broadcast %19 : vector<8x1xi32> to vector<8x128xi32>
    %22 = arith.cmpi eq, %20, %21 : vector<8x128xi32>
    %c0_6 = arith.constant 0 : index
    %c0_7 = arith.constant 0 : index
    %23 = vector.load %arg3[%c0_6, %c0_7] : memref<1x128xf32, #tpu.memory_space<vmem>>, vector<1x128xf32>
    %c0_8 = arith.constant 0 : index
    %c0_9 = arith.constant 0 : index
    %24 = vector.load %arg4[%c0_8, %c0_9] : memref<1x128xf32, #tpu.memory_space<vmem>>, vector<1x128xf32>
    %25 = arith.mulf %23, %24 : vector<1x128xf32>
    %26 = vector.broadcast %25 : vector<1x128xf32> to vector<8x128xf32>
    %27 = arith.mulf %18, %26 : vector<8x128xf32>
    %cst_10 = arith.constant 0.000000e+00 : f32
    %28 = vector.broadcast %cst_10 : f32 to vector<8x128xf32>
    %29 = arith.select %22, %27, %28 : vector<8x128xi1>, vector<8x128xf32>
    %30 = vector.shape_cast %29 : vector<8x128xf32> to vector<1x8x128xf32>
    %cst_11 = arith.constant dense<0.000000e+00> : vector<1xf32>
    %31 = vector.multi_reduction <add>, %30, %cst_11 [1, 2] : vector<1x8x128xf32> to vector<1xf32>
    %32 = vector.shape_cast %31 : vector<1xf32> to vector<1x1x1xf32>
    %33 = vector.extract %32[0, 0, 0] : f32 from vector<1x1x1xf32>
    %cst_12 = arith.constant 0.000000e+00 : f32
    %34 = arith.subf %cst_12, %33 : f32
    %c0_13 = arith.constant 0 : index
    %c0_14 = arith.constant 0 : index
    %35 = vector.load %arg4[%c0_13, %c0_14] : memref<1x128xf32, #tpu.memory_space<vmem>>, vector<1x128xf32>
    %cst_15 = arith.constant 0.000000e+00 : f32
    %36 = vector.shape_cast %35 : vector<1x128xf32> to vector<1x128xf32>
    %37 = vector.broadcast %36 : vector<1x128xf32> to vector<8x128xf32>
    %38 = vector.broadcast %cst_15 : f32 to vector<8x128xf32>
    %39 = arith.select %22, %37, %38 : vector<8x128xi1>, vector<8x128xf32>
    %40 = vector.shape_cast %39 : vector<8x128xf32> to vector<1x8x128xf32>
    %cst_16 = arith.constant dense<0.000000e+00> : vector<1xf32>
    %41 = vector.multi_reduction <add>, %40, %cst_16 [1, 2] : vector<1x8x128xf32> to vector<1xf32>
    %42 = vector.shape_cast %41 : vector<1xf32> to vector<1x1x1xf32>
    %43 = vector.extract %42[0, 0, 0] : f32 from vector<1x1x1xf32>
    %c0_17 = arith.constant 0 : index
    %c0_18 = arith.constant 0 : index
    %44 = vector.load %arg5[%c0_17, %c0_18] : memref<1x1xf32, #tpu.memory_space<vmem>>, vector<1x1xf32>
    %45 = vector.broadcast %34 : f32 to vector<1x1xf32>
    %46 = arith.addf %44, %45 : vector<1x1xf32>
    %c0_19 = arith.constant 0 : index
    %c0_20 = arith.constant 0 : index
    %47 = vector.load %arg5[%c0_19, %c0_20] : memref<1x1xf32, #tpu.memory_space<vmem>>, vector<1x1xf32>
    tpu.vector_store %arg5[%c0_19, %c0_20], %46 {strides = array<i32>} : memref<1x1xf32, #tpu.memory_space<vmem>>, vector<1x1xf32>,
    %c0_21 = arith.constant 0 : index
    %c0_22 = arith.constant 0 : index
    %48 = vector.load %arg6[%c0_21, %c0_22] : memref<1x1xf32, #tpu.memory_space<vmem>>, vector<1x1xf32>
    %49 = vector.broadcast %43 : f32 to vector<1x1xf32>
    %50 = arith.addf %48, %49 : vector<1x1xf32>
    %c0_23 = arith.constant 0 : index
    %c0_24 = arith.constant 0 : index
    %51 = vector.load %arg6[%c0_23, %c0_24] : memref<1x1xf32, #tpu.memory_space<vmem>>, vector<1x1xf32>
    tpu.vector_store %arg6[%c0_23, %c0_24], %50 {strides = array<i32>} : memref<1x1xf32, #tpu.memory_space<vmem>>, vector<1x1xf32>,
    return
  }
  func.func @transform_0(%arg0: i32) -> (i32, i32) {
    %c0_i32 = arith.constant 0 : i32
    %c0_i32_0 = arith.constant 0 : i32
    return %arg0, %c0_i32 : i32, i32
  }
  func.func @transform_1(%arg0: i32) -> (i32, i32) {
    %c0_i32 = arith.constant 0 : i32
    %c0_i32_0 = arith.constant 0 : i32
    return %arg0, %c0_i32 : i32, i32
  }
  func.func @transform_2(%arg0: i32) -> (i32, i32) {
    %c0_i32 = arith.constant 0 : i32
    %c0_i32_0 = arith.constant 0 : i32
    %c0_i32_1 = arith.constant 0 : i32
    return %c0_i32, %c0_i32_0 : i32, i32
  }
  func.func @transform_3(%arg0: i32) -> (i32, i32) {
    %c0_i32 = arith.constant 0 : i32
    %c0_i32_0 = arith.constant 0 : i32
    %c0_i32_1 = arith.constant 0 : i32
    return %c0_i32, %c0_i32_0 : i32, i32
  }
  func.func @transform_4(%arg0: i32) -> (i32, i32) {
    %c0_i32 = arith.constant 0 : i32
    %c0_i32_0 = arith.constant 0 : i32
    %c0_i32_1 = arith.constant 0 : i32
    return %c0_i32, %c0_i32_0 : i32, i32
  }
  func.func @transform_5(%arg0: i32) -> (i32, i32) {
    %c0_i32 = arith.constant 0 : i32
    %c0_i32_0 = arith.constant 0 : i32
    %c0_i32_1 = arith.constant 0 : i32
    return %c0_i32, %c0_i32_0 : i32, i32
  }
}

</mosaic_0001>

<bundles_post_ra>
// kernel: tpu_custom_call.1
= control target key start
LH: loop header
LB: loop body
LE: loop exit
PB: predicated region body
PF: predicated region fallthrough
CT: control target
= control target key end

     0   :  { %11 = vsyncpa [#allocation3], 0  ;;  %s614_s0 = inlined_call_operand.vmem [shape: f32[16,128], index: 0, kind: input, shape index: {}]   ;;  %s615_s1 = inlined_call_operand.vmem [shape: s32[16,1], index: 1, kind: input, shape index: {}]   ;;  %s616_s2 = inlined_call_operand.vmem [shape: f32[1,128], index: 2, kind: input, shape index: {}]   ;;  %s617_s3 = inlined_call_operand.vmem [shape: f32[1,128], index: 3, kind: input, shape index: {}]   ;;  %s618_s4 = inlined_call_operand.hbm [shape: f32[1,1], index: 4, kind: output, shape index: {0}]   ;;  %s619_s5 = inlined_call_operand.hbm [shape: f32[1,1], index: 5, kind: output, shape index: {1}]  }
   0x1   :  { %12 = vsyncpa [#allocation5], 0  ;;  %s531_s18 = smov 0  }
   0x2 LB: > { %s537_s19 = sadd.s32 4294967295, %s495_s18   ;;  %p383_p0 = scmp.ge.s32.totalorder %s495_s18, 1  ;;  %s495_s18 = sphi %s531_s18, %s18_s18  }
   0x3   : > { %p190_p1 = scmp.lt.s32.totalorder %s495_s18, 3 }
   0x5   : > { %p191_p2 = pnand %p383_p0, %p190_p1 }
   0x6   : > { %p216_p3 = scmp.lt.s32.totalorder (!%p191_p2), %s537_s19, 1  ;;  %p386_p4 = scmp.ne.s32.totalorder (!%p191_p2), %s537_s19, 0 }
   0x7   : > { %194 = sbr.rel (%p191_p2) target bundleno = 606 (0x25e), region = 36 }
   0xe   : > { %s217_s20 = scalar_select %p216_p3, %s537_s19, 1 }
   0xf   : > { %227 = sbr.rel (%p386_p4) target bundleno = 22 (0x16), region = 40  ;;  %vm228_vm0 = vcmask (!%p386_p4), 0   ;;  %v497_v0 = vmov (!%p386_p4), 0.0  }
  0x10   : > { %s384_s21 = sshll.u32 %s217_s20, 3  ;;  %229 = vst.msk [vmem:[#allocation2] sm:$0x1] (!%p386_p4), %vm228_vm0, %v497_v0  ;;  %230 = vst.msk [vmem:[#allocation4] sm:$0x1] (!%p386_p4), %vm228_vm0, %v497_v0 }
  0x11   : > { %s219_s24 = scalar_lea.vmem %s614_s0, %s384_s21  ;;  %s223_s27 = scalar_lea.vmem %s615_s1, %s384_s21 }
  0x16 PF: > { %v231_v1 = vld [vmem:[%s219_s24] sm:$0xff]  ;;  %v498_v3 = vmov 0   ;;  %v248_v8 = vlaneseq  ;;  %s499_s7 = smov [#allocation2]   ;;  %s500_s10 = smov [#allocation4]   ;;  %vm294_vm2 = vcmask 0  }
  0x17   : > { %232 = vmax.xlane.f32.xlu0 %v231_v1  ;;  %v247_v2 = vld [vmem:[%s223_s27] sm:$0xff]  ;;  %421 = vset.pattern.permute.xlu1 %v498_v3  ;;  %s307_s8 = sshll.u32 %s499_s7, 4  ;;  %s318_s11 = sshll.u32 %s500_s10, 4  ;;  %s319_s11 = int_to_ptr.vmem [resolvable:$true] %s318_s11  ;;  %s559_s8 = int_to_ptr.vmem [resolvable:$true] %s307_s8 }
  0x18   : > { %422 = vset.pattern.permute.xlu0 %v498_v3  ;;  %251 = vperm.xlu1 %421, %v247_v2   ;;  %v249_v9 = vand.u32 127, %v248_v8  ;;  %v259_v11 = vshrl.u32 %v248_v8, 7  ;;  %v255_v12 = vld [vmem:[%s617_s3] sm:$0x1]  ;;  %v296_v44 = vld [vmem:[#allocation4] sm:$0x1]  ;;  %p436_p9 = scmp.lt.s32.totalorder %s319_s11, %s319_s11 }
  0x19   : > { %v254_v15 = vld [vmem:[%s616_s2] sm:$0x1]  ;;  %p405_p5 = scmp.eq.s32.totalorder %s537_s19, 1  ;;  %s429_s14 = scalar_lea.vmem %s319_s11, 16 }
  0x1a   : > { %v260_v13 = vsub.s32 0, %v259_v11  ;;  %v256_v17 = vmul.f32 %v255_v12, %v254_v15  ;;  %v291_v45 = vld [vmem:[#allocation2] sm:$0x1]  ;;  %p430_p6 = scmp.ne.s32.totalorder %s319_s11, %s429_s14  ;;  %s435_s15 = scalar_lea.vmem %s319_s11, 32 }
  0x1b   : > { %p437_p10 = scmp.lt.s32.totalorder %s435_s15, %s429_s14 }
  0x1c   : > { %v279_v14 = vrot.slane %v255_v12, %v260_v13  ;;  %v261_v18 = vrot.slane %v256_v17, %v260_v13  ;;  %p431_p7 = pnand %p430_p6, %p405_p5 }
  0x1d   : > { %p438_p11 = por %p437_p10, %p436_p9 }
  0x1e   : > { %p432_p8 = pneg %p431_p7 }
  0x20   : > { %p439_p12 = pnand %p438_p11, %p432_p8 }
  0x97   : > { %v252_v10 = vpop.permute.xlu1 %251 }
  0x98   : > { %vm253_vm1 = vcmp.eq.s32.totalorder %v249_v9, %v252_v10 }
  0x99   : > { %v281_v16 = vsel %vm253_vm1, %v279_v14, 0.0 }
  0xa4   : > { %v233_v4 = vpop.xlane.xlu0 %232 }
  0xa5   : > { %v234_v5 = vsub.f32 %v231_v1, %v233_v4 }
  0xa7   : > { %v235_v6 = vmul.f32 1.442695, %v234_v5 }
  0xa9   : > { %423 = vpow2.f32 %v235_v6 }
  0xb3   : > { %v424_v7 = vpop.eup %423 }
  0xb4   : > { %237 = vadd.xlane.f32.xlu0 %v424_v7 }
  0xb8   : > { %282 = vadd.xlane.f32.xlu0 %v281_v16 }
 0x141   : > { %v238_v19 = vpop.xlane.xlu0 %237 }
 0x142   : > { %425 = vlog2.f32 %v238_v19 }
 0x145   : > { %v283_v30 = vpop.xlane.xlu0 %282 }
 0x146   : > { %v284_v31 = vrot.slane %v283_v30, 4 }
 0x148   : > { %v285_v32 = vadd.f32 %v284_v31, %v283_v30 }
 0x14a   : > { %v286_v33 = vrot.slane %v285_v32, 2 }
 0x14c   : > { %v426_v20 = vpop.eup %425  ;;  %v287_v37 = vadd.f32 %v286_v33, %v285_v32 }
 0x14d   : > { %v240_v21 = vmul.f32 0.6931472, %v426_v20 }
 0x14e   : > { %v288_v40 = vrot.slane %v287_v37, 1 }
 0x14f   : > { %v241_v22 = vsub.f32 %v234_v5, %v240_v21 }
 0x150   : > { %v289_v43 = vadd.f32 %v288_v40, %v287_v37 }
 0x151   : > { %v242_v23 = vmul.f32 1.442695, %v241_v22 }
 0x153   : > { %427 = vpow2.f32 %v242_v23 }
 0x15d   : > { %v428_v24 = vpop.eup %427 }
 0x15e   : > { %v244_v25 = vsub.f32 1.0, %v428_v24 }
 0x160   : > { %v245_v26 = vmul.f32 %v244_v25, %v244_v25 }
 0x162   : > { %v246_v27 = vmul.f32 %v245_v26, %v241_v22 }
 0x164   : > { %v263_v28 = vmul.f32 %v261_v18, %v246_v27 }
 0x166   : > { %v264_v29 = vsel %vm253_vm1, %v263_v28, 0.0 }
 0x167   : > { %265 = vadd.xlane.f32.xlu1 %v264_v29 }
 0x1f4   : > { %v266_v34 = vpop.xlane.xlu1 %265 }
 0x1f5   : > { %v267_v35 = vrot.slane %v266_v34, 4 }
 0x1f7   : > { %v268_v36 = vadd.f32 %v267_v35, %v266_v34 }
 0x1f9   : > { %v269_v38 = vrot.slane %v268_v36, 2 }
 0x1fb   : > { %v270_v39 = vadd.f32 %v269_v38, %v268_v36 }
 0x1fd   : > { %v271_v41 = vrot.slane %v270_v39, 1 }
 0x1ff   : > { %v272_v42 = vadd.f32 %v271_v41, %v270_v39 }
 0x201   : > { %393 = vpush %v272_v42 }
 0x202   : > { %395 = vpush %v289_v43 }
 0x232   : > { %s394_s9 = spop %393 }
 0x233   : > { %s274_s12 = ssub.f32 0.0, %s394_s9  ;;  %s396_s13 = spop %395 }
 0x234   : > { %v297_v46 = vstv %s396_s13 }
 0x235   : > { %v292_v47 = vstv %s274_s12  ;;  %v298_v48 = vadd.f32 %v297_v46, %v296_v44 }
 0x236   : > { %v293_v49 = vadd.f32 %v292_v47, %v291_v45 }
 0x237   : > { %299 = vst.msk [vmem:[#allocation4] sm:$0x1] %vm294_vm2, %v298_v48 }
 0x238   : > { %295 = vst.msk [vmem:[#allocation2] sm:$0x1] %vm294_vm2, %v293_v49 }
 0x239   : > { %442 = shalt.err (!%p439_p12)
}
 0x23a   : > { %s443_s20 = scalar_lea.hbm %s619_s5, 16 }
 0x23b   : > { %p444_p13 = scmp.ne.s32.totalorder %s619_s5, %s443_s20  ;;  %p449_p2 = scmp.lt.u32.totalorder %s443_s20, %s619_s5 }
 0x23d   : > { %p445_p0 = pnand %p444_p13, %p405_p5 }
 0x23f   : > { %p446_p1 = pneg %p445_p0 }
 0x241   : > { %p451_p3 = pnand %p449_p2, %p446_p1 }
 0x243   : > { %454 = shalt.err (!%p451_p3)
}
 0x244   : > { %400 = dma.vmem_to_hbm [thread:$0]  (%p405_p5), %s319_s11, 16, %s619_s5, [#allocation5]  }
 0x245   : > { %s455_s27 = scalar_lea.vmem %s559_s8, 16  ;;  %s461_s28 = scalar_lea.vmem %s559_s8, 32 }
 0x246   : > { %p456_p4 = scmp.ne.s32.totalorder %s559_s8, %s455_s27  ;;  %p462_p8 = scmp.lt.s32.totalorder %s559_s8, %s559_s8 }
 0x247   : > { %p463_p9 = scmp.lt.s32.totalorder %s461_s28, %s455_s27 }
 0x248   : > { %p457_p6 = pnand %p456_p4, %p405_p5 }
 0x249   : > { %p464_p10 = por %p463_p9, %p462_p8 }
 0x24a   : > { %p458_p7 = pneg %p457_p6 }
 0x24c   : > { %p465_p11 = pnand %p464_p10, %p458_p7 }
 0x24e   : > { %468 = shalt.err (!%p465_p11)
}
 0x24f   : > { %s469_s6 = scalar_lea.hbm %s618_s4, 16 }
 0x250   : > { %p470_p12 = scmp.ne.s32.totalorder %s618_s4, %s469_s6  ;;  %p475_p1 = scmp.lt.u32.totalorder %s469_s6, %s618_s4 }
 0x252   : > { %p471_p13 = pnand %p470_p12, %p405_p5 }
 0x254   : > { %p472_p0 = pneg %p471_p13 }
 0x256   : > { %p477_p2 = pnand %p475_p1, %p472_p0 }
 0x258   : > { %480 = shalt.err (!%p477_p2)
}
 0x259   : > { %398 = dma.vmem_to_hbm [thread:$0]  (%p405_p5), %s559_s8, 16, %s618_s4, [#allocation3]  }
 0x25a   : > { %486 = dma.done.wait (%p405_p5), [#allocation3], 16  }
 0x25b   : > { %488 = vsyncadd (%p405_p5), [#allocation3], 4294967280 }
 0x25c   : > { %490 = dma.done.wait (%p405_p5), [#allocation5], 16  }
 0x25d   : > { %492 = vsyncadd (%p405_p5), [#allocation5], 4294967280 }
 0x25e PF: > { %s18_s18 = sadd.s32 1, %s495_s18  }
 0x25f   : > { %p15_p3 = scmp.ge.s32.totalorder %s18_s18, 4  }
 0x261   :  { %17 = sbr.rel (!%p15_p3) target bundleno = 2 (0x2), region = 78 }
 0x268   :  { %335 = vsyncpa [#allocation3], 1 }
 0x269   :  { %337 = vsyncpa [#allocation3 + $0x1], 1 }
 0x26a   :  { %338 = vsyncpa [#allocation5], 1 }

</bundles_post_ra>
